<compile_context>
chip_gen: v7x
topology: tpu7x:2x2x1
jax: 0.10.0
libtpu: 0.0.40
codegen_flags: <defaults>
</compile_context>

<pallas_src>
import functools

import numpy as np
import jax
import jax.numpy as jnp
from jax.experimental import pallas as pl
from jax.experimental.pallas import tpu as pltpu

NUM_CF = 2  # num_cf in the PyTorch module


def _round_up(x, m):
    return ((x + m - 1) // m) * m


def _vmem_limit_bytes():
    """Generation-aware VMEM request: ~70% of capacity, capped at 100 MiB."""
    try:
        cap = pltpu.get_tpu_info().vmem_capacity_bytes
    except Exception:  # interpret mode / query unsupported
        cap = 64 * 1024 * 1024
    return int(min(cap * 0.7, 100 * 1024 * 1024))


# ---------------------------------------------------------------------------
# Fused im2col + single-dot GEMM Pallas kernel
# ---------------------------------------------------------------------------
def _make_conv_kernel(offsets, tm, single_m_tile):
    """Builds the kernel body.

    x_ref: (1, Cin, Lp)            whole padded, flattened image (one batch elem)
    w_ref: (tco, Cin*KH*KW)        lane-dense folded weights
    o_ref: (1, tco, tm)            flattened NCHW output tile (lanes = spatial)
    """

    def kernel(x_ref, w_ref, o_ref):
        if single_m_tile:
            m0 = 0  # static slice starts -> cheapest lowering
        else:
            m0 = pl.multiple_of(pl.program_id(2) * tm, 128)
        # Build the stacked patch once: (Cin*KH*KW, tm).  Row order matches the
        # wrapper's weight flattening ((kh*KW + kw)*Cin + ci).
        patches = [x_ref[0, :, pl.ds(m0 + off, tm)] for off in offsets]
        stacked = jnp.concatenate(patches, axis=0)
        # ONE MXU matmul with K = Cin*KH*KW (f32 accumulation).
        acc = jnp.dot(w_ref[...], stacked, preferred_element_type=jnp.float32)
        o_ref[0, :, :] = acc.astype(o_ref.dtype)

    return kernel


# ---------------------------------------------------------------------------
# SConv2d forward
# ---------------------------------------------------------------------------
def sconv2d_forward(x_nchw, templates, coefficients, stride=1, padding=1,
                    *, compute_dtype=jnp.bfloat16, tile_m=None):
    """
    x_nchw:       (N, Cin, H, W)
    templates:    (T, Cout, Cin, KH, KW)   -- the bank's shared templates
    coefficients: (NUM_CF, T, 1, 1, 1, 1)  -- per-copy mixing coefficients
    compute_dtype: MXU operand / kernel-output dtype (bf16 default, f32 for checks)
    tile_m:        optional override of the spatial tile (testing the tiled path)
    """
    # ---- bank mixing (tiny elementwise work; plain JAX glue, f32) ----
    num_cf = coefficients.shape[0]
    param_list = [jnp.sum(coefficients[i] * templates, axis=0) for i in range(num_cf)]
    final_params = jnp.mean(jnp.stack(param_list), axis=0)        # (Cout, Cin, KH, KW)

    N, Cin, H, W = x_nchw.shape
    Cout, _, KH, KW = final_params.shape
    p = padding
    Hp, Wp = H + 2 * p, W + 2 * p
    # Internal conv is computed at stride 1; stride>1 is a subsample of it.
    Ho1, Wo1 = Hp - KH + 1, Wp - KW + 1
    M_out = Ho1 * Wp                          # overcompute across the padded width
    halo = (KH - 1) * Wp + (KW - 1)
    K = Cin * KH * KW

    # ---- tiling (large lane-dense blocks; everything a multiple of 128) ----
    M_rounded = _round_up(M_out, 128)
    if tile_m is not None:
        tm = _round_up(tile_m, 128)
    elif M_rounded <= 8192:
        tm = M_rounded                        # single lane-dense block (v5e/v6e friendly)
    else:
        tm = 2048
    n_m = pl.cdiv(M_out, tm)
    M_pad = n_m * tm
    if Cout > 256 and Cout % 256 == 0:
        tco = 256
    else:
        tco = Cout
    n_co = Cout // tco

    # ---- input prep: NCHW spatial pad -> flatten -> tail pad -> compute dtype ----
    # (one fused XLA pass over the input; no KH*KW-blown-up im2col in HBM)
    Lp = M_pad + halo
    xflat = jnp.pad(x_nchw, ((0, 0), (0, 0), (p, p), (p, p))).reshape(N, Cin, Hp * Wp)
    xflat = jnp.pad(xflat, ((0, 0), (0, 0), (0, Lp - Hp * Wp))).astype(compute_dtype)

    # Weights folded once in the wrapper: (Cout, Cin, KH, KW) -> (Cout, KH*KW*Cin),
    # lane-dense on the contraction axis, matching the kernel's stacked-patch order.
    w = jnp.transpose(final_params, (0, 2, 3, 1)).reshape(Cout, K).astype(compute_dtype)

    offsets = [kh * Wp + kw for kh in range(KH) for kw in range(KW)]
    kernel = _make_conv_kernel(offsets, tm, single_m_tile=(n_m == 1))

    out_dtype = jnp.float32 if compute_dtype == jnp.float32 else jnp.bfloat16
    itemsize = jnp.dtype(compute_dtype).itemsize
    flops = 2 * N * Cout * M_pad * K
    bytes_accessed = (N * Cin * Lp * itemsize + Cout * K * itemsize
                      + N * Cout * M_pad * jnp.dtype(out_dtype).itemsize)

    out_flat = pl.pallas_call(
        kernel,
        out_shape=jax.ShapeDtypeStruct((N, Cout, M_pad), out_dtype),
        grid=(N, n_co, n_m),
        in_specs=[
            # Whole padded image per batch element; re-fetched only when n changes.
            # TODO(synk): for very large Cin*H*W on v7x, switch to a windowed
            # spatial fetch (tm + halo block) to shrink VMEM residency.
            pl.BlockSpec((1, Cin, Lp), lambda n, c, m: (n, 0, 0)),
            # Folded lane-dense weights; constant across n/m grid steps.
            pl.BlockSpec((tco, K), lambda n, c, m: (c, 0)),
        ],
        out_specs=pl.BlockSpec((1, tco, tm), lambda n, c, m: (n, c, m)),
        compiler_params=pltpu.CompilerParams(
            # m is "arbitrary": the megacore split happens over N / n_co, so the
            # resident image is not duplicated in both v7x TensorCores' VMEM.
            dimension_semantics=("parallel", "parallel", "arbitrary"),
            vmem_limit_bytes=_vmem_limit_bytes(),
        ),
        cost_estimate=pl.CostEstimate(
            flops=flops, transcendentals=0, bytes_accessed=bytes_accessed
        ),
    )(xflat, w)

    # Free reshape (contiguous) + narrow width slice back to NCHW output.
    out = out_flat[:, :, : Ho1 * Wp].reshape(N, Cout, Ho1, Wp)[:, :, :, :Wo1]
    out = out.astype(x_nchw.dtype)
    if stride > 1:
        # TODO(synk): stride>1 falls back to stride-1 conv + subsample (correct,
        # but stride^2 overcompute); not exercised by the module default.
        out = out[:, :, ::stride, ::stride]
    return out


# ---------------------------------------------------------------------------
# Plain-JAX reference (for correctness check only)
# ---------------------------------------------------------------------------
def sconv2d_reference(x_nchw, templates, coefficients, stride=1, padding=1):
    num_cf = coefficients.shape[0]
    param_list = [jnp.sum(coefficients[i] * templates, axis=0) for i in range(num_cf)]
    final_params = jnp.mean(jnp.stack(param_list), axis=0)
    return jax.lax.conv_general_dilated(
        x_nchw,
        final_params,
        window_strides=(stride, stride),
        padding=[(padding, padding), (padding, padding)],
        dimension_numbers=("NCHW", "OIHW", "NCHW"),
        precision=jax.lax.Precision.HIGHEST,
    )


if __name__ == "__main__":
    # Small shapes consistent with the module.
    N, Cin, H, W = 2, 4, 16, 16
    Cout, KH, KW = 8, 3, 3
    num_templates = 4
    stride, padding = 1, 1

    key = jax.random.PRNGKey(0)
    k_x, k_t, k_c = jax.random.split(key, 3)

    x = jax.random.normal(k_x, (N, Cin, H, W), dtype=jnp.float32)
    templates = jax.random.normal(
        k_t, (num_templates, Cout, Cin, KH, KW), dtype=jnp.float32
    ) * 0.1
    # Module __init__ uses zeros for coefficients (all-zero output); use small
    # deterministic random values so the kernel is actually exercised.
    coefficients = jax.random.normal(
        k_c, (NUM_CF, num_templates, 1, 1, 1, 1), dtype=jnp.float32
    ) * 0.5

    ref = sconv2d_reference(x, templates, coefficients, stride=stride, padding=padding)

    # 1) f32 compute path with a tighter tolerance (catches indexing / halo bugs).
    fwd_f32 = jax.jit(functools.partial(
        sconv2d_forward, stride=stride, padding=padding, compute_dtype=jnp.float32))
    out_f32 = jax.block_until_ready(fwd_f32(x, templates, coefficients))
    np.testing.assert_allclose(np.asarray(out_f32), np.asarray(ref), rtol=1e-2, atol=1e-3)

    # 2) Default bf16 MXU path (bf16 operands + bf16 kernel output, f32 accumulate).
    fwd_bf16 = jax.jit(functools.partial(sconv2d_forward, stride=stride, padding=padding))
    out_bf16 = jax.block_until_ready(fwd_bf16(x, templates, coefficients))
    np.testing.assert_allclose(np.asarray(out_bf16), np.asarray(ref), rtol=3e-2, atol=3e-2)

    # 3) Force the multi-m-tile path (n_m>1, tail padding + final slice) on the
    #    same small input, to exercise the tiled code path.
    fwd_tiled = jax.jit(functools.partial(
        sconv2d_forward, stride=stride, padding=padding, tile_m=128))
    out_tiled = jax.block_until_ready(fwd_tiled(x, templates, coefficients))
    np.testing.assert_allclose(np.asarray(out_tiled), np.asarray(ref), rtol=3e-2, atol=3e-2)

    print("KERNEL_OK")
</pallas_src>

<mosaic_0001>
module attributes {stable_mosaic.version = 11 : i64} {
  func.func @kernel(%arg0: i32, %arg1: i32, %arg2: i32, %arg3: memref<1x4x422xf32, #tpu.memory_space<vmem>>, %arg4: memref<8x36xf32, #tpu.memory_space<vmem>>, %arg5: memref<1x8x384xf32, #tpu.memory_space<vmem>>) attributes {dimension_semantics = [#tpu.dimension_semantics<parallel>, #tpu.dimension_semantics<parallel>, #tpu.dimension_semantics<arbitrary>], iteration_bounds = array<i64: 2, 1, 1>, scalar_prefetch = 0 : i64, scratch_operands = 0 : i64, tpu.core_type = #tpu.core_type<tc>, window_params = [{transform_indices = @transform_0, window_bounds = array<i64: 1, 4, 422>}, {transform_indices = @transform_1, window_bounds = array<i64: 8, 36>}, {transform_indices = @transform_2, window_bounds = array<i64: 1, 8, 384>}]} {
    %c0 = arith.constant 0 : index
    %c0_0 = arith.constant 0 : index
    %c0_1 = arith.constant 0 : index
    %0 = vector.load %arg3[%c0, %c0_0, %c0_1] : memref<1x4x422xf32, #tpu.memory_space<vmem>>, vector<1x4x384xf32>
    %1 = vector.shape_cast %0 : vector<1x4x384xf32> to vector<4x384xf32>
    %c0_2 = arith.constant 0 : index
    %c0_3 = arith.constant 0 : index
    %c1 = arith.constant 1 : index
    %2 = vector.load %arg3[%c0_2, %c0_3, %c1] : memref<1x4x422xf32, #tpu.memory_space<vmem>>, vector<1x4x384xf32>
    %3 = vector.shape_cast %2 : vector<1x4x384xf32> to vector<4x384xf32>
    %c0_4 = arith.constant 0 : index
    %c0_5 = arith.constant 0 : index
    %c2 = arith.constant 2 : index
    %4 = vector.load %arg3[%c0_4, %c0_5, %c2] : memref<1x4x422xf32, #tpu.memory_space<vmem>>, vector<1x4x384xf32>
    %5 = vector.shape_cast %4 : vector<1x4x384xf32> to vector<4x384xf32>
    %c0_6 = arith.constant 0 : index
    %c0_7 = arith.constant 0 : index
    %c18 = arith.constant 18 : index
    %6 = vector.load %arg3[%c0_6, %c0_7, %c18] : memref<1x4x422xf32, #tpu.memory_space<vmem>>, vector<1x4x384xf32>
    %7 = vector.shape_cast %6 : vector<1x4x384xf32> to vector<4x384xf32>
    %c0_8 = arith.constant 0 : index
    %c0_9 = arith.constant 0 : index
    %c19 = arith.constant 19 : index
    %8 = vector.load %arg3[%c0_8, %c0_9, %c19] : memref<1x4x422xf32, #tpu.memory_space<vmem>>, vector<1x4x384xf32>
    %9 = vector.shape_cast %8 : vector<1x4x384xf32> to vector<4x384xf32>
    %c0_10 = arith.constant 0 : index
    %c0_11 = arith.constant 0 : index
    %c20 = arith.constant 20 : index
    %10 = vector.load %arg3[%c0_10, %c0_11, %c20] : memref<1x4x422xf32, #tpu.memory_space<vmem>>, vector<1x4x384xf32>
    %11 = vector.shape_cast %10 : vector<1x4x384xf32> to vector<4x384xf32>
    %c0_12 = arith.constant 0 : index
    %c0_13 = arith.constant 0 : index
    %c36 = arith.constant 36 : index
    %12 = vector.load %arg3[%c0_12, %c0_13, %c36] : memref<1x4x422xf32, #tpu.memory_space<vmem>>, vector<1x4x384xf32>
    %13 = vector.shape_cast %12 : vector<1x4x384xf32> to vector<4x384xf32>
    %c0_14 = arith.constant 0 : index
    %c0_15 = arith.constant 0 : index
    %c37 = arith.constant 37 : index
    %14 = vector.load %arg3[%c0_14, %c0_15, %c37] : memref<1x4x422xf32, #tpu.memory_space<vmem>>, vector<1x4x384xf32>
    %15 = vector.shape_cast %14 : vector<1x4x384xf32> to vector<4x384xf32>
    %c0_16 = arith.constant 0 : index
    %c0_17 = arith.constant 0 : index
    %c38 = arith.constant 38 : index
    %16 = vector.load %arg3[%c0_16, %c0_17, %c38] : memref<1x4x422xf32, #tpu.memory_space<vmem>>, vector<1x4x384xf32>
    %17 = vector.shape_cast %16 : vector<1x4x384xf32> to vector<4x384xf32>
    %18 = tpu.concatenate %1, %3, %5, %7, %9, %11, %13, %15, %17 in 0 : vector<4x384xf32>, vector<4x384xf32>, vector<4x384xf32>, vector<4x384xf32>, vector<4x384xf32>, vector<4x384xf32>, vector<4x384xf32>, vector<4x384xf32>, vector<4x384xf32> -> vector<36x384xf32>
    %c0_18 = arith.constant 0 : index
    %c0_19 = arith.constant 0 : index
    %19 = vector.load %arg4[%c0_18, %c0_19] : memref<8x36xf32, #tpu.memory_space<vmem>>, vector<8x36xf32>
    %cst = arith.constant dense<0.000000e+00> : vector<8x384xf32>
    %20 = tpu.matmul %19, %18, %cst {dimension_numbers = #tpu.dot_dimension_numbers<[1], [0], [0], [1], [0, 0, 1, 1], [], []>} : vector<8x36xf32>, vector<36x384xf32>, vector<8x384xf32> -> vector<8x384xf32>
    %c0_20 = arith.constant 0 : index
    %c0_21 = arith.constant 0 : index
    %c0_22 = arith.constant 0 : index
    %21 = vector.load %arg5[%c0_20, %c0_21, %c0_22] : memref<1x8x384xf32, #tpu.memory_space<vmem>>, vector<1x8x384xf32>
    %22 = vector.shape_cast %21 : vector<1x8x384xf32> to vector<8x384xf32>
    %23 = vector.shape_cast %20 : vector<8x384xf32> to vector<1x8x384xf32>
    tpu.vector_store %arg5[%c0_20, %c0_21, %c0_22], %23 {strides = array<i32>} : memref<1x8x384xf32, #tpu.memory_space<vmem>>, vector<1x8x384xf32>,
    return
  }
  func.func @transform_0(%arg0: i32, %arg1: i32, %arg2: i32) -> (i32, i32, i32) {
    %c0_i32 = arith.constant 0 : i32
    %c0_i32_0 = arith.constant 0 : i32
    %c0_i32_1 = arith.constant 0 : i32
    return %arg0, %c0_i32, %c0_i32_0 : i32, i32, i32
  }
  func.func @transform_1(%arg0: i32, %arg1: i32, %arg2: i32) -> (i32, i32) {
    %c0_i32 = arith.constant 0 : i32
    %c0_i32_0 = arith.constant 0 : i32
    return %arg1, %c0_i32 : i32, i32
  }
  func.func @transform_2(%arg0: i32, %arg1: i32, %arg2: i32) -> (i32, i32, i32) {
    %c0_i32 = arith.constant 0 : i32
    return %arg0, %arg1, %arg2 : i32, i32, i32
  }
}

</mosaic_0001>

<bundles_post_ra>
// kernel: sconv2d_forward.1
= control target key start
LH: loop header
LB: loop body
LE: loop exit
PB: predicated region body
PF: predicated region fallthrough
CT: control target
= control target key end

     0   :  { %s821_s9 = smov 0   ;;  %s823_s10 = smov 0   ;;  %s920_s0 = inlined_call_operand.vmem [shape: f32[2,4,422], index: 0, kind: input, shape index: {}]   ;;  %s921_s1 = inlined_call_operand.vmem [shape: f32[8,36], index: 1, kind: input, shape index: {}]   ;;  %s922_s2 = inlined_call_operand.vmem [shape: f32[2,8,384], index: 2, kind: output, shape index: {}]  }
   0x1   :  { %s825_s11 = smov 0  }
   0x2 LB: > { %s31_s12 = sadd.s32 1, %s789_s10  ;;  %p616_p0 = scmp.ge.s32.totalorder %s793_s11, 1  ;;  %s793_s11 = sphi %s825_s11, %s12_s11   ;;  %s789_s10 = sphi %s823_s10, %s924_s10   ;;  %s785_s9 = sphi %s821_s9, %s923_s9  }
   0x3   : > { %p33_p1 = scmp.ge.s32.totalorder %s31_s12, 2  ;;  %p144_p2 = scmp.lt.s32.totalorder %s793_s11, 3 }
   0x5   : > { %s926_s12 = smov (%p33_p1, %s31_s12), 0  ;;  %p145_p3 = pnand %p616_p0, %p144_p2 }
   0x6   : > { %p178_p4 = scmp.lt.s32.totalorder (!%p145_p3), %s785_s9, 1  ;;  %s795_s17 = smov (!%p145_p3), 110   ;;  %v797_v9 = vmov (!%p145_p3), 0.0|0.0   ;;  %v803_v11 = vmov (!%p145_p3), 0.0   ;;  %vm804_vm0 = vmmov (!%p145_p3), 0   ;;  %vm218_vm1 = vcmask (!%p145_p3), 1039360  }
   0x7   : > { %148 = sbr.rel (%p145_p3) target bundleno = 386 (0x182), region = 28  ;;  %s796_s18 = smov (!%p145_p3), 127   ;;  %655 = vmatprep.subr.bf16.mxu1 (!%p145_p3), %v797_v9  ;;  %416 = vmatprep.mubr.f32.mxu0 (!%p145_p3), %v803_v11  ;;  %vm234_vm2 = vcmask (!%p145_p3), 1031168   ;;  %vm249_vm3 = vcmask (!%p145_p3), 900096   ;;  %vm328_vm4 = vcmask (!%p145_p3), 1043456   ;;  %vm279_vm5 = vcmask (!%p145_p3), 883712  }
   0x8   : > { %s798_s19 = smov (!%p145_p3), 126   ;;  %s799_s20 = smov (!%p145_p3), 108   ;;  %644 = vmatprep.mubr.msk.f32.mxu1 (!%p145_p3), %vm804_vm0, %v803_v11  ;;  %vm264_vm6 = vcmask (!%p145_p3), 891904   ;;  %vm309_vm7 = vcmask (!%p145_p3), 744448   ;;  %vm294_vm8 = vcmask (!%p145_p3), 752640   ;;  %vm324_vm9 = vcmask (!%p145_p3), 736256  }
   0x9   : > { %s800_s21 = smov (!%p145_p3), 109   ;;  %s801_s22 = smov (!%p145_p3), 91   ;;  %vm342_vm10 = vcmask (!%p145_p3), 293888  }
   0xa   : > { %s802_s23 = smov (!%p145_p3), 92   ;;  %s805_s24 = smov (!%p145_p3), 90  }
   0xe   : > { %s928_s9 = smov (!%p178_p4, %s785_s9), 1 }
   0xf   : > { %s627_s13 = sshll.u32 %s928_s9, 4  ;;  %s661_s27 = smul.u32 24, %s928_s9 }
  0x10   : > { %s845_s16 = scalar_lea.vmem %s920_s0, %s627_s13 }
  0x11   : > { %v848_v0 = vld [vmem:[%s845_s16] sm:$0xff]  ;;  %v203_v1 = vld [vmem:[%s845_s16 + $0x8] sm:$0xff]  ;;  %s199_s30 = scalar_lea.vmem %s922_s2, %s661_s27 }
  0x12   : > { %v209_v2 = vcombine.low %v203_v1, %v203_v1  ;;  %v208_v3 = vcombine.low %v848_v0, %v848_v0  ;;  %v205_v4 = vcombine.high %v848_v0, %v848_v0  ;;  %v225_v8 = vcombine.high %v203_v1, %v203_v1  ;;  %v202_v37 = vld [vmem:[%s845_s16 + $0x8] sm:$0xf] }
  0x14   : > { %v707_v5 = vpack.i.bf16 %v209_v2, %v848_v0  ;;  %v712_v6 = vpack.i.bf16 %v203_v1, %v208_v3  ;;  %v702_v7 = vpack.i.bf16 %v203_v1, %v205_v4  ;;  %v717_v10 = vpack.i.bf16 %v225_v8, %v848_v0 }
  0x16   : > { %708 = vrot.lane.b32.xlu1 %v707_v5, %s795_s17  ;;  %698 = vrot.lane.b32.xlu0 %v707_v5, %s796_s18 }
  0x1a   : > { %713 = vrot.lane.b32.xlu1 %v712_v6, %s796_s18  ;;  %703 = vrot.lane.b32.xlu0 %v702_v7, %s798_s19 }
  0x1e   : > { %723 = vrot.lane.b32.xlu1 %v712_v6, %s795_s17  ;;  %718 = vrot.lane.b32.xlu0 %v717_v10, %s798_s19 }
  0x22   : > { %733 = vrot.lane.b32.xlu1 %v707_v5, %s799_s20  ;;  %728 = vrot.lane.b32.xlu0 %v702_v7, %s800_s21 }
  0x26   : > { %743 = vrot.lane.b32.xlu1 %v707_v5, %s801_s22  ;;  %738 = vrot.lane.b32.xlu0 %v702_v7, %s802_s23 }
  0x2a   : > { %753 = vrot.lane.b32.xlu1 %v712_v6, %s799_s20  ;;  %748 = vrot.lane.b32.xlu0 %v717_v10, %s800_s21 }
  0x2e   : > { %763 = vrot.lane.b32.xlu1 %v712_v6, %s801_s22  ;;  %758 = vrot.lane.b32.xlu0 %v717_v10, %s802_s23 }
  0x32   : > { %320 = vrot.lane.b32.xlu1 %v203_v1, %s805_s24  ;;  %318 = vrot.lane.b32.xlu0 %v205_v4, %s805_s24 }
  0x36   : > { %322 = vrot.lane.b32.xlu1 %v225_v8, %s805_s24  ;;  %316 = vrot.lane.b32.xlu0 %v848_v0, %s805_s24 }
  0x88   : > { %v709_v12 = vpop.permute.xlu1 %708  ;;  %v699_v13 = vpop.permute.xlu0 %698 }
  0x89   : > { %v701_v14 = vunpack.i.h.bf16 %v699_v13  ;;  %v700_v15 = vunpack.i.l.bf16 %v699_v13  ;;  %v711_v16 = vunpack.i.h.bf16 %v709_v12  ;;  %v710_v17 = vunpack.i.l.bf16 %v709_v12 }
  0x8b   : > { %v220_v20 = vsel %vm218_vm1, %v700_v15, %v701_v14  ;;  %v251_v26 = vsel %vm249_vm3, %v710_v17, %v711_v16 }
  0x8c   : > { %v714_v18 = vpop.permute.xlu1 %713  ;;  %v704_v19 = vpop.permute.xlu0 %703  ;;  %v330_v29 = vsel %vm328_vm4, %v205_v4, %v220_v20 }
  0x8d   : > { %v716_v21 = vunpack.i.h.bf16 %v714_v18  ;;  %v715_v22 = vunpack.i.l.bf16 %v714_v18  ;;  %v706_v23 = vunpack.i.h.bf16 %v704_v19  ;;  %v705_v24 = vunpack.i.l.bf16 %v704_v19 }
  0x8f   : > { %v236_v25 = vsel %vm234_vm2, %v705_v24, %v706_v23  ;;  %v219_v31 = vsel %vm218_vm1, %v715_v22, %v700_v15  ;;  %v221_v32 = vsel %vm218_vm1, %v701_v14, %v716_v21 }
  0x90   : > { %v724_v27 = vpop.permute.xlu1 %723  ;;  %v719_v28 = vpop.permute.xlu0 %718  ;;  %v333_v30 = vsel %vm328_vm4, %v236_v25, %v251_v26  ;;  %v329_v45 = vsel %vm328_vm4, %v848_v0, %v219_v31  ;;  %v331_v47 = vsel %vm328_vm4, %v202_v37, %v221_v32 }
  0x91   : > { %v726_v33 = vunpack.i.h.bf16 %v724_v27  ;;  %v725_v34 = vunpack.i.l.bf16 %v724_v27  ;;  %v721_v35 = vunpack.i.h.bf16 %v719_v28  ;;  %v720_v36 = vunpack.i.l.bf16 %v719_v28 }
  0x92   : > { %v647_v38 = vpack.c.bf16 %v333_v30, %v330_v29 }
  0x93   : > { %v235_v39 = vsel %vm234_vm2, %v720_v36, %v705_v24  ;;  %v250_v40 = vsel %vm249_vm3, %v725_v34, %v710_v17  ;;  %v237_v41 = vsel %vm234_vm2, %v706_v23, %v721_v35  ;;  %v252_v42 = vsel %vm249_vm3, %v711_v16, %v726_v33 }
  0x94   : > { %648 = vmatprep.subr.bf16.mxu0 %v647_v38  ;;  %v734_v43 = vpop.permute.xlu1 %733  ;;  %v729_v44 = vpop.permute.xlu0 %728  ;;  %v332_v46 = vsel %vm328_vm4, %v235_v39, %v250_v40  ;;  %v334_v48 = vsel %vm328_vm4, %v237_v41, %v252_v42  ;;  %v341_v38 = vld [vmem:[%s921_s1] sm:$0xff] }
  0x95   : > { %v736_v49 = vunpack.i.h.bf16 %v734_v43  ;;  %v735_v50 = vunpack.i.l.bf16 %v734_v43  ;;  %v731_v51 = vunpack.i.h.bf16 %v729_v44  ;;  %v730_v52 = vunpack.i.l.bf16 %v729_v44 }
  0x96   : > { %v649_v53 = vpack.c.bf16 %v332_v46, %v329_v45  ;;  %v656_v54 = vpack.c.bf16 %v334_v48, %v331_v47 }
  0x97   : > { %v281_v55 = vsel %vm279_vm5, %v735_v50, %v736_v49  ;;  %v266_v56 = vsel %vm264_vm6, %v730_v52, %v731_v51 }
  0x98   : > { %650 = vmatpush1.bf16.msra.mxu0 %v649_v53  ;;  %657 = vmatpush3.bf16.msra.mxu1 %v656_v54  ;;  %v744_v57 = vpop.permute.xlu1 %743  ;;  %v739_v58 = vpop.permute.xlu0 %738  ;;  %v336_v3 = vsel %vm328_vm4, %v266_v56, %v281_v55 }
  0x99   : > { %v746_v59 = vunpack.i.h.bf16 %v744_v57  ;;  %v745_v60 = vunpack.i.l.bf16 %v744_v57  ;;  %v741_v61 = vunpack.i.h.bf16 %v739_v58  ;;  %v740_v62 = vunpack.i.l.bf16 %v739_v58  ;;  %658 = vmatprep.subr.bf16.mxu1 %v797_v9 }
  0x9b   : > { %v311_v63 = vsel %vm309_vm7, %v745_v60, %v746_v59  ;;  %v296_v0 = vsel %vm294_vm8, %v740_v62, %v741_v61 }
  0x9c   : > { %v754_v1 = vpop.permute.xlu1 %753  ;;  %v749_v2 = vpop.permute.xlu0 %748  ;;  %v339_v4 = vsel %vm328_vm4, %v296_v0, %v311_v63 }
  0x9d   : > { %v756_v5 = vunpack.i.h.bf16 %v754_v1  ;;  %v755_v6 = vunpack.i.l.bf16 %v754_v1  ;;  %v751_v7 = vunpack.i.h.bf16 %v749_v2  ;;  %v750_v8 = vunpack.i.l.bf16 %v749_v2 }
  0x9e   : > { %v651_v10 = vpack.c.bf16 %v339_v4, %v336_v3 }
  0x9f   : > { %v280_v12 = vsel %vm279_vm5, %v755_v6, %v735_v50  ;;  %v282_v13 = vsel %vm279_vm5, %v736_v49, %v756_v5  ;;  %v265_v9 = vsel %vm264_vm6, %v750_v8, %v730_v52  ;;  %v267_v14 = vsel %vm264_vm6, %v731_v51, %v751_v7 }
  0xa0   : > { %652 = vmatprep.subr.bf16.mxu0 %v651_v10  ;;  %v764_v15 = vpop.permute.xlu1 %763  ;;  %v759_v16 = vpop.permute.xlu0 %758  ;;  %v335_v27 = vsel %vm328_vm4, %v265_v9, %v280_v12  ;;  %v337_v29 = vsel %vm328_vm4, %v267_v14, %v282_v13 }
  0xa1   : > { %v766_v17 = vunpack.i.h.bf16 %v764_v15  ;;  %v765_v18 = vunpack.i.l.bf16 %v764_v15  ;;  %v761_v19 = vunpack.i.h.bf16 %v759_v16  ;;  %v760_v20 = vunpack.i.l.bf16 %v759_v16 }
  0xa3   : > { %v310_v21 = vsel %vm309_vm7, %v765_v18, %v745_v60  ;;  %v312_v22 = vsel %vm309_vm7, %v746_v59, %v766_v17  ;;  %v295_v23 = vsel %vm294_vm8, %v760_v20, %v740_v62  ;;  %v297_v24 = vsel %vm294_vm8, %v741_v61, %v761_v19 }
  0xa4   : > { %v321_v25 = vpop.permute.xlu1 %320  ;;  %v319_v26 = vpop.permute.xlu0 %318  ;;  %v338_v28 = vsel %vm328_vm4, %v295_v23, %v310_v21  ;;  %v340_v30 = vsel %vm328_vm4, %v297_v24, %v312_v22 }
  0xa5   : > { %v326_v31 = vsel %vm324_vm9, %v319_v26, %v321_v25  ;;  %v653_v32 = vpack.c.bf16 %v338_v28, %v335_v27  ;;  %v659_v33 = vpack.c.bf16 %v340_v30, %v337_v29 }
  0xa7   : > { %654 = vmatpush1.bf16.msra.mxu0 %v653_v32  ;;  %660 = vmatpush3.bf16.msra.mxu1 %v659_v33 }
  0xa8   : > { %v323_v34 = vpop.permute.xlu1 %322  ;;  %v317_v35 = vpop.permute.xlu0 %316  ;;  %620 = vmatprep.subr.msk.mxu0 %vm328_vm4, %v326_v31  ;;  %642 = vmatprep.subr.mxu1 %v803_v11 }
  0xa9   : > { %v327_v36 = vsel %vm324_vm9, %v321_v25, %v323_v34  ;;  %v325_v37 = vsel %vm324_vm9, %v317_v35, %v319_v26 }
  0xab   : > { %621 = vmatpush1.msk.msra.mxu0 %vm328_vm4, %v325_v37  ;;  %643 = vmatpush3.msk.msra.mxu1 %vm328_vm4, %v327_v36 }
  0xac   : > { %622 = vmatmul.mubr.msk.f32.vlgmr.msra.gmra.mrb[0].mxu0 %vm342_vm10, %v341_v38  ;;  %645 = vmatmul.mubr.msk.f32.vlgmr.msra.gmra.mrb[0].mxu1 %vm342_vm10, %v341_v38 }
 0x17f   : > { %v418_v11 = vpop.f32.mrb[0].mxu0  ;;  %v489_v39 = vpop.f32.mrb[0].mxu1 }
 0x180   : > { %493 = vst [vmem:[%s199_s30] sm:$0xff] %v418_v11  ;;  %495 = vst [vmem:[%s199_s30 + $0x10] sm:$0xff] %v489_v39  ;;  %v420_v40 = vpop.f32.mrb[1].mxu0  ;;  %v646_v41 = vpop.f32.mrb[1].mxu1 }
 0x181   : > { %494 = vst [vmem:[%s199_s30 + $0x8] sm:$0xff] %v420_v40 }
 0x182 PF: > { %s12_s11 = sadd.s32 1, %s793_s11   ;;  %s923_s9 = smov %s789_s10 }
 0x183   : > { %p9_p5 = scmp.ge.s32.totalorder %s12_s11, 4   ;;  %s924_s10 = smov %s926_s12 }
 0x185   :  { %11 = sbr.rel (!%p9_p5) target bundleno = 2 (0x2), region = 61 }

</bundles_post_ra>
